<compile_context>
chip_gen: v7x
topology: tpu7x:2x2x1
jax: 0.10.0
libtpu: 0.0.40
codegen_flags: <defaults>
</compile_context>

<pallas_src>
import math

import jax
import jax.numpy as jnp
from jax.experimental import pallas as pl
from jax.experimental.pallas import tpu as pltpu

LANE = 128
_MiB = 1024 * 1024


def _pad_to(x, m):
    return ((x + m - 1) // m) * m


def _largest_tile(n, cap, base=LANE):
    """Largest multiple of `base`, <= cap, that divides n (n % base == 0)."""
    m = min(cap, n)
    t = max(base, m - (m % base))
    while n % t:
        t -= base
    return t


# ----------------------------- kernels --------------------------------------


def _support_kernel(x_ref, w_ref, s_ref):
    # support row-tile = x_tile @ W  (bf16 operands, f32 accumulation on MXU)
    s_ref[...] = jnp.dot(
        x_ref[...], w_ref[...], preferred_element_type=jnp.float32
    ).astype(s_ref.dtype)


def _aggregate_kernel(adj_ref, s_ref, b_ref, out_ref):
    # out row-tile (f32, resident across k) accumulates adj_tile @ support_tile.
    k = pl.program_id(1)
    tile_k = adj_ref.shape[1]

    @pl.when(k == 0)
    def _():
        out_ref[...] = jnp.broadcast_to(b_ref[...], out_ref.shape)

    if s_ref.shape[0] == tile_k:
        # Streamed K tile (or single-K / full-row case).
        s_tile = s_ref[...]
    else:
        # Support resident in VMEM: slice the current K window.
        start = pl.multiple_of(k * tile_k, tile_k)
        s_tile = s_ref[pl.ds(start, tile_k), :]

    out_ref[...] += jnp.dot(adj_ref[...], s_tile, preferred_element_type=jnp.float32)


# ----------------------------- wrapper ---------------------------------------


def prepare_params(weight, bias):
    """One-time parameter prep (padding + bf16 cast), hoisted out of forward."""
    f_in, f_out = weight.shape
    f_in_p, f_out_p = _pad_to(f_in, LANE), _pad_to(f_out, LANE)
    w_p = (
        jnp.zeros((f_in_p, f_out_p), jnp.float32)
        .at[:f_in, :f_out]
        .set(weight)
        .astype(jnp.bfloat16)
    )
    b_p = jnp.zeros((1, f_out_p), jnp.float32)
    if bias is not None:
        b_p = b_p.at[0, :f_out].set(bias)
    return w_p, b_p, f_out


def graph_convolution(adj, x, w_p, b_p, f_out, *, tile_m=1024, tile_k=2048,
                      support_tile=512):
    """Pallas GCN forward: adj @ (x @ W) + b.  (self.act is never applied in forward)."""
    n, f_in = x.shape
    assert adj.shape == (n, n)
    f_in_p, f_out_p = w_p.shape

    # --- pad shapes so all tiles are (8,128)-aligned; zero padding is exact. ---
    n_p = _pad_to(n, LANE)
    x_bf = x.astype(jnp.bfloat16)
    adj_bf = adj.astype(jnp.bfloat16)
    if f_in_p != f_in:
        x_bf = jnp.pad(x_bf, ((0, 0), (0, f_in_p - f_in)))
    if n_p != n:
        x_bf = jnp.pad(x_bf, ((0, n_p - n), (0, 0)))
        adj_bf = jnp.pad(adj_bf, ((0, n_p - n), (0, n_p - n)))

    # --- tile selection ---------------------------------------------------------
    tile_m = _largest_tile(n_p, tile_m)
    if n_p // tile_m < 2 and n_p % (2 * LANE) == 0 and n_p >= 2 * LANE:
        # Keep >= 2 row tiles so the 'parallel' axis can use both v7x TensorCores.
        tile_m = n_p // 2
    if 2 * tile_m * n_p * 2 <= 16 * _MiB:
        # Double-buffered bf16 adj row slab fits VMEM: take full contiguous rows.
        tile_k = n_p
    else:
        tile_k = _largest_tile(n_p, tile_k)

    # Keep support resident in VMEM when it fits (it is tiny: n * 128 * 2 B).
    support_resident = 2 * n_p * f_out_p * 2 <= 16 * _MiB

    # --- 1) support = x @ W (small, row-parallel) --------------------------------
    tile_s = _largest_tile(n_p, support_tile)
    support = pl.pallas_call(
        _support_kernel,
        out_shape=jax.ShapeDtypeStruct((n_p, f_out_p), jnp.bfloat16),
        grid_spec=pltpu.PrefetchScalarGridSpec(
            num_scalar_prefetch=0,
            grid=(n_p // tile_s,),
            in_specs=[
                pl.BlockSpec((tile_s, f_in_p), lambda i: (i, 0)),     # x row tile
                pl.BlockSpec((f_in_p, f_out_p), lambda i: (0, 0)),    # full weight
            ],
            out_specs=pl.BlockSpec((tile_s, f_out_p), lambda i: (i, 0)),
        ),
        compiler_params=pltpu.CompilerParams(
            dimension_semantics=("parallel",),
        ),
    )(x_bf, w_p)

    # --- 2) out = adj @ support + bias (row tiles parallel, K reduction last) ----
    if support_resident:
        s_spec = pl.BlockSpec((n_p, f_out_p), lambda i, k: (0, 0))    # resident
        s_rows = n_p
    else:
        s_spec = pl.BlockSpec((tile_k, f_out_p), lambda i, k: (k, 0))  # streamed
        s_rows = tile_k

    footprint = (
        2 * tile_m * tile_k * 2        # adj tiles (bf16, double-buffered)
        + 2 * s_rows * f_out_p * 2     # support (bf16)
        + 2 * tile_m * f_out_p * 4     # output tile (f32)
        + 2 * f_out_p * 4              # bias
    )
    vmem_limit = int(min(max(footprint + 8 * _MiB, 32 * _MiB), 56 * _MiB))

    grid = (n_p // tile_m, n_p // tile_k)
    out_p = pl.pallas_call(
        _aggregate_kernel,
        out_shape=jax.ShapeDtypeStruct((n_p, f_out_p), jnp.float32),
        grid_spec=pltpu.PrefetchScalarGridSpec(
            num_scalar_prefetch=0,
            grid=grid,
            in_specs=[
                pl.BlockSpec((tile_m, tile_k), lambda i, k: (i, k)),   # adj tile
                s_spec,                                                # support
                pl.BlockSpec((1, f_out_p), lambda i, k: (0, 0)),       # bias
            ],
            out_specs=pl.BlockSpec((tile_m, f_out_p), lambda i, k: (i, 0)),
        ),
        compiler_params=pltpu.CompilerParams(
            dimension_semantics=("parallel", "arbitrary"),
            vmem_limit_bytes=vmem_limit,
        ),
    )(adj_bf, support, b_p)

    return out_p[:n, :f_out]


def init_params(key, in_features, out_features):
    # Matches reset_parameters(): uniform(-stdv, stdv), stdv = 1/sqrt(out_features)
    stdv = 1.0 / math.sqrt(out_features)
    k_w, k_b = jax.random.split(key)
    weight = jax.random.uniform(
        k_w, (in_features, out_features), jnp.float32, -stdv, stdv
    )
    bias = jax.random.uniform(k_b, (out_features,), jnp.float32, -stdv, stdv)
    return weight, bias


if __name__ == "__main__":
    key = jax.random.PRNGKey(0)
    k_adj, k_x, k_param = jax.random.split(key, 3)

    N = 256          # number of graph nodes
    F_IN = 64        # in_features
    F_OUT = 32       # out_features

    # Dense "normalized adjacency"-like matrix and node features.
    adj = jax.random.uniform(k_adj, (N, N), jnp.float32, 0.0, 1.0) / N
    x = jax.random.normal(k_x, (N, F_IN), jnp.float32)

    weight, bias = init_params(k_param, F_IN, F_OUT)

    # Parameter padding / casts hoisted out of the per-call forward path.
    w_p, b_p, f_out = prepare_params(weight, bias)

    out = graph_convolution(adj, x, w_p, b_p, f_out)
    out = jax.block_until_ready(out)

    # Reference check (plain JAX, f32). Tolerance loosened for bf16 operands
    # with f32 accumulation inside the kernels.
    ref = adj @ (x @ weight) + bias
    assert out.shape == (N, F_OUT)
    assert jnp.allclose(out, ref, atol=2e-2, rtol=2e-2)

    print("KERNEL_OK")
</pallas_src>

<mosaic_0001>
module attributes {stable_mosaic.version = 11 : i64} {
  func.func @_support_kernel(%arg0: i32, %arg1: memref<256x128xbf16, #tpu.memory_space<vmem>>, %arg2: memref<128x128xbf16, #tpu.memory_space<vmem>>, %arg3: memref<256x128xbf16, #tpu.memory_space<vmem>>) attributes {dimension_semantics = [#tpu.dimension_semantics<parallel>], iteration_bounds = array<i64: 1>, scalar_prefetch = 0 : i64, scratch_operands = 0 : i64, tpu.core_type = #tpu.core_type<tc>, window_params = [{transform_indices = @transform_0, window_bounds = array<i64: 256, 128>}, {pipeline_mode = #tpu.pipeline_mode<synchronous>, transform_indices = @transform_1, window_bounds = array<i64: 128, 128>}, {transform_indices = @transform_2, window_bounds = array<i64: 256, 128>}]} {
    %c0 = arith.constant 0 : index
    %c0_0 = arith.constant 0 : index
    %0 = vector.load %arg1[%c0, %c0_0] : memref<256x128xbf16, #tpu.memory_space<vmem>>, vector<256x128xbf16>
    %c0_1 = arith.constant 0 : index
    %c0_2 = arith.constant 0 : index
    %1 = vector.load %arg2[%c0_1, %c0_2] : memref<128x128xbf16, #tpu.memory_space<vmem>>, vector<128x128xbf16>
    %cst = arith.constant dense<0.000000e+00> : vector<256x128xf32>
    %2 = tpu.matmul %0, %1, %cst {dimension_numbers = #tpu.dot_dimension_numbers<[1], [0], [0], [1], [0, 0, 1, 1], [], []>} : vector<256x128xbf16>, vector<128x128xbf16>, vector<256x128xf32> -> vector<256x128xf32>
    %3 = arith.truncf %2 : vector<256x128xf32> to vector<256x128xbf16>
    %c0_3 = arith.constant 0 : index
    %c0_4 = arith.constant 0 : index
    %4 = vector.load %arg3[%c0_3, %c0_4] : memref<256x128xbf16, #tpu.memory_space<vmem>>, vector<256x128xbf16>
    tpu.vector_store %arg3[%c0_3, %c0_4], %3 {strides = array<i32>} : memref<256x128xbf16, #tpu.memory_space<vmem>>, vector<256x128xbf16>,
    return
  }
  func.func @transform_0(%arg0: i32) -> (i32, i32) {
    %c0_i32 = arith.constant 0 : i32
    %c0_i32_0 = arith.constant 0 : i32
    return %arg0, %c0_i32 : i32, i32
  }
  func.func @transform_1(%arg0: i32) -> (i32, i32) {
    %c0_i32 = arith.constant 0 : i32
    %c0_i32_0 = arith.constant 0 : i32
    %c0_i32_1 = arith.constant 0 : i32
    return %c0_i32, %c0_i32_0 : i32, i32
  }
  func.func @transform_2(%arg0: i32) -> (i32, i32) {
    %c0_i32 = arith.constant 0 : i32
    %c0_i32_0 = arith.constant 0 : i32
    return %arg0, %c0_i32 : i32, i32
  }
}

</mosaic_0001>

<bundles_post_ra>
// kernel: tpu_custom_call.1
= control target key start
LH: loop header
LB: loop body
LE: loop exit
PB: predicated region body
PF: predicated region fallthrough
CT: control target
= control target key end

     0   :  { %7 = vsyncpa [#allocation3], 0  ;;  %s1009_s0 = inlined_call_operand.hbm [shape: bf16[256,128], index: 0, kind: input, shape index: {}]   ;;  %s1010_s1 = inlined_call_operand.hbm [shape: bf16[128,128], index: 1, kind: input, shape index: {}]   ;;  %s1011_s2 = inlined_call_operand.hbm [shape: bf16[256,128], index: 2, kind: output, shape index: {}]  }
   0x1   :  { %8 = vsyncpa [#allocation6], 0 }
   0x2   :  { %9 = vsyncpa [#allocation4], 0  ;;  %s944_s9 = smov [#allocation2]   ;;  %s872_s13 = scalar_lea.hbm %s1009_s0, 2048 }
   0x3   :  { %s15_s10 = sshll.u32 %s944_s9, 4  ;;  %p873_p0 = scmp.ne.s32.totalorder %s1009_s0, %s872_s13  ;;  %s16_s10 = int_to_ptr.vmem [resolvable:$true] %s15_s10 }
   0x4   :  { %p876_p1 = scmp.lt.u32.totalorder %s872_s13, %s1009_s0 }
   0x6   :  { %p878_p2 = pnand %p876_p1, %p873_p0 }
   0x8   :  { %881 = shalt.err (!%p878_p2)
}
   0x9   :  { %s882_s18 = scalar_lea.vmem %s16_s10, 2048  ;;  %p887_p4 = scmp.lt.s32.totalorder %s16_s10, %s16_s10 }
   0xa   :  { %p883_p3 = scmp.ne.s32.totalorder %s16_s10, %s882_s18  ;;  %p888_p5 = scmp.lt.s32.totalorder %s882_s18, %s882_s18 }
   0xc   :  { %p889_p6 = por %p888_p5, %p887_p4 }
   0xe   :  { %p890_p7 = pnand %p889_p6, %p883_p3 }
  0x10   :  { %893 = shalt.err (!%p890_p7)
}
  0x11   :  { %s945_s19 = smov 64   ;;  %s946_s20 = smov 4  }
  0x12   :  { %21 = dma.hbm_to_vmem [thread:$0]  %s1009_s0, 2048, %s16_s10, [#allocation3], %s945_s19, %s945_s19, %s946_s20  }
  0x13   :  { %s947_s23 = smov [#allocation5]   ;;  %s894_s27 = scalar_lea.hbm %s1010_s1, 1024 }
  0x14   :  { %s27_s24 = sshll.u32 %s947_s23, 4  ;;  %p895_p8 = scmp.ne.s32.totalorder %s1010_s1, %s894_s27  ;;  %s28_s24 = int_to_ptr.vmem [resolvable:$true] %s27_s24 }
  0x15   :  { %p898_p9 = scmp.lt.u32.totalorder %s894_s27, %s1010_s1 }
  0x17   :  { %p900_p10 = pnand %p898_p9, %p895_p8 }
  0x19   :  { %903 = shalt.err (!%p900_p10)
}
  0x1a   :  { %s904_s4 = scalar_lea.vmem %s28_s24, 1024  ;;  %p909_p12 = scmp.lt.s32.totalorder %s28_s24, %s28_s24 }
  0x1b   :  { %p905_p11 = scmp.ne.s32.totalorder %s28_s24, %s904_s4  ;;  %p910_p13 = scmp.lt.s32.totalorder %s904_s4, %s904_s4 }
  0x1d   :  { %p911_p0 = por %p910_p13, %p909_p12 }
  0x1f   :  { %p912_p1 = pnand %p911_p0, %p905_p11 }
  0x21   :  { %915 = shalt.err (!%p912_p1)
}
  0x22   :  { %33 = dma.hbm_to_vmem [thread:$0]  %s1010_s1, 1024, %s28_s24, [#allocation6], %s945_s19, %s945_s19, %s946_s20  }
  0x23   :  { %938 = dma.done.wait [#allocation3], 2048  }
  0x24   :  { %939 = vsyncadd [#allocation3], 4294965248 }
  0x25   :  { %940 = dma.done.wait [#allocation6], 1024  }
  0x26   :  { %941 = vsyncadd [#allocation6], 4294966272  ;;  %v848_v0 = vld [vmem:[#allocation5] sm:$0xff]   ;;  %v849_v1 = vld [vmem:[#allocation5 + $0x8] sm:$0xff]   ;;  %s948_s1 = smov [#allocation7]  }
  0x27   :  { %779 = vmatprep.subr.bf16.mxu0 %v848_v0  ;;  %827 = vmatprep.subr.bf16.mxu1 %v848_v0  ;;  %v850_v2 = vld [vmem:[#allocation5 + $0x10] sm:$0xff]   ;;  %v851_v3 = vld [vmem:[#allocation5 + $0x18] sm:$0xff]   ;;  %v856_v4 = vld [vmem:[#allocation2] sm:$0xff]   ;;  %s559_s6 = sshll.u32 %s948_s1, 4  ;;  %s560_s6 = int_to_ptr.vmem [resolvable:$true] %s559_s6 }
  0x28   :  { %780 = vmatpush3.bf16.msra.mxu0 %v848_v0  ;;  %835 = vmatpush3.bf16.msra.mxu1 %v848_v0  ;;  %v857_v5 = vld [vmem:[#allocation2 + $0x40] sm:$0xff]   ;;  %v853_v7 = vld [vmem:[#allocation5 + $0x28] sm:$0xff]   ;;  %v854_v8 = vld [vmem:[#allocation5 + $0x30] sm:$0xff]   ;;  %s916_s7 = scalar_lea.vmem %s560_s6, 2048  ;;  %p921_p3 = scmp.lt.s32.totalorder %s560_s6, %s560_s6 }
  0x29   :  { %781 = vmatprep.subr.bf16.mxu0 %v849_v1  ;;  %828 = vmatprep.subr.bf16.mxu1 %v849_v1  ;;  %v852_v6 = vld [vmem:[#allocation5 + $0x20] sm:$0xff]   ;;  %v855_v9 = vld [vmem:[#allocation5 + $0x38] sm:$0xff]   ;;  %v858_v10 = vld [vmem:[#allocation2 + $0x8] sm:$0xff]   ;;  %p917_p2 = scmp.ne.s32.totalorder %s560_s6, %s916_s7  ;;  %p922_p4 = scmp.lt.s32.totalorder %s916_s7, %s916_s7 }
  0x2a   :  { %795 = vmatprep.mubr.bf16.mxu0 %v856_v4  ;;  %811 = vmatprep.mubr.bf16.mxu1 %v857_v5  ;;  %v859_v11 = vld [vmem:[#allocation2 + $0x48] sm:$0xff]   ;;  %v860_v12 = vld [vmem:[#allocation2 + $0x10] sm:$0xff]   ;;  %v862_v14 = vld [vmem:[#allocation2 + $0x18] sm:$0xff]  }
  0x2b   :  { %v861_v13 = vld [vmem:[#allocation2 + $0x50] sm:$0xff]   ;;  %v863_v15 = vld [vmem:[#allocation2 + $0x58] sm:$0xff]   ;;  %v864_v16 = vld [vmem:[#allocation2 + $0x20] sm:$0xff]   ;;  %p923_p5 = por %p922_p4, %p921_p3 }
  0x2c   :  { %782 = vmatpush3.bf16.msra.mxu0 %v849_v1  ;;  %836 = vmatpush3.bf16.msra.mxu1 %v849_v1  ;;  %v865_v17 = vld [vmem:[#allocation2 + $0x60] sm:$0xff]   ;;  %v866_v18 = vld [vmem:[#allocation2 + $0x28] sm:$0xff]   ;;  %v868_v20 = vld [vmem:[#allocation2 + $0x30] sm:$0xff]  }
  0x2d   :  { %783 = vmatprep.subr.bf16.mxu0 %v850_v2  ;;  %829 = vmatprep.subr.bf16.mxu1 %v850_v2  ;;  %v867_v19 = vld [vmem:[#allocation2 + $0x68] sm:$0xff]   ;;  %v869_v21 = vld [vmem:[#allocation2 + $0x70] sm:$0xff]   ;;  %v870_v22 = vld [vmem:[#allocation2 + $0x38] sm:$0xff]   ;;  %p924_p6 = pnand %p923_p5, %p917_p2 }
  0x2e   :  { %v871_v23 = vld [vmem:[#allocation2 + $0x78] sm:$0xff]  }
  0x30   :  { %784 = vmatpush3.bf16.msra.mxu0 %v850_v2  ;;  %837 = vmatpush3.bf16.msra.mxu1 %v850_v2 }
  0x31   :  { %785 = vmatprep.subr.bf16.mxu0 %v851_v3  ;;  %830 = vmatprep.subr.bf16.mxu1 %v851_v3 }
  0x34   :  { %786 = vmatpush3.bf16.msra.mxu0 %v851_v3  ;;  %838 = vmatpush3.bf16.msra.mxu1 %v851_v3 }
  0x35   :  { %787 = vmatprep.subr.bf16.mxu0 %v852_v6  ;;  %831 = vmatprep.subr.bf16.mxu1 %v852_v6 }
  0x38   :  { %788 = vmatpush3.bf16.msra.mxu0 %v852_v6  ;;  %839 = vmatpush3.bf16.msra.mxu1 %v852_v6 }
  0x39   :  { %789 = vmatprep.subr.bf16.mxu0 %v853_v7  ;;  %832 = vmatprep.subr.bf16.mxu1 %v853_v7 }
  0x3c   :  { %790 = vmatpush3.bf16.msra.mxu0 %v853_v7  ;;  %840 = vmatpush3.bf16.msra.mxu1 %v853_v7 }
  0x3d   :  { %791 = vmatprep.subr.bf16.mxu0 %v854_v8  ;;  %833 = vmatprep.subr.bf16.mxu1 %v854_v8 }
  0x40   :  { %792 = vmatpush3.bf16.msra.mxu0 %v854_v8  ;;  %841 = vmatpush3.bf16.msra.mxu1 %v854_v8 }
  0x41   :  { %793 = vmatprep.subr.bf16.mxu0 %v855_v9  ;;  %834 = vmatprep.subr.bf16.mxu1 %v855_v9 }
  0x44   :  { %794 = vmatpush3.bf16.msra.mxu0 %v855_v9  ;;  %842 = vmatpush3.bf16.msra.mxu1 %v855_v9 }
  0x47   :  { %796 = vmatmul.mubr.bf16.vlgmr.msra.gmra.mrb[0].mxu0 %v858_v10  ;;  %812 = vmatmul.mubr.bf16.vlgmr.msra.gmra.mrb[0].mxu1 %v859_v11 }
  0x48   :  { %799 = vmatprep.mubr.bf16.mxu0 %v860_v12  ;;  %815 = vmatprep.mubr.bf16.mxu1 %v861_v13 }
  0x4f   :  { %800 = vmatmul.mubr.bf16.gmra.mrb[4].mxu0 %v862_v14  ;;  %816 = vmatmul.mubr.bf16.gmra.mrb[4].mxu1 %v863_v15 }
  0x50   :  { %803 = vmatprep.mubr.bf16.mxu0 %v864_v16  ;;  %819 = vmatprep.mubr.bf16.mxu1 %v865_v17 }
  0x57   :  { %804 = vmatmul.mubr.bf16.gmra.mrb[8].mxu0 %v866_v18  ;;  %820 = vmatmul.mubr.bf16.gmra.mrb[8].mxu1 %v867_v19 }
  0x58   :  { %807 = vmatprep.mubr.bf16.mxu0 %v868_v20  ;;  %823 = vmatprep.mubr.bf16.mxu1 %v869_v21 }
  0x5f   :  { %808 = vmatmul.mubr.bf16.gmra.mrb[12].mxu0 %v870_v22  ;;  %824 = vmatmul.mubr.bf16.gmra.mrb[12].mxu1 %v871_v23 }
 0x11a   :  { %v797_v24 = vpop.f32.mrb[0].mxu0  ;;  %v813_v25 = vpop.f32.mrb[0].mxu1 }
 0x11b   :  { %v267_v26 = vpop.f32.mrb[1].mxu0  ;;  %v331_v27 = vpop.f32.mrb[1].mxu1 }
 0x11c   :  { %v798_v28 = vpop.f32.mrb[2].mxu0  ;;  %v814_v29 = vpop.f32.mrb[2].mxu1 }
 0x11d   :  { %v668_v30 = vpack.c.bf16 %v798_v28, %v797_v24  ;;  %v708_v31 = vpack.c.bf16 %v814_v29, %v813_v25  ;;  %v270_v32 = vpop.f32.mrb[3].mxu0  ;;  %v334_v33 = vpop.f32.mrb[3].mxu1 }
 0x11e   :  { %v663_v34 = vpack.c.bf16 %v270_v32, %v267_v26  ;;  %v703_v35 = vpack.c.bf16 %v334_v33, %v331_v27 }
 0x11f   :  { %740 = vst [vmem:[#allocation7 + $0x8] sm:$0xff] %v668_v30   ;;  %748 = vst [vmem:[#allocation7 + $0x48] sm:$0xff] %v708_v31  }
 0x120   :  { %664 = vst [vmem:[#allocation7] sm:$0xff] %v663_v34   ;;  %747 = vst [vmem:[#allocation7 + $0x40] sm:$0xff] %v703_v35  }
 0x122   :  { %v801_v36 = vpop.f32.mrb[4].mxu0  ;;  %v817_v37 = vpop.f32.mrb[4].mxu1 }
 0x123   :  { %v283_v38 = vpop.f32.mrb[5].mxu0  ;;  %v347_v39 = vpop.f32.mrb[5].mxu1 }
 0x124   :  { %v802_v40 = vpop.f32.mrb[6].mxu0  ;;  %v818_v41 = vpop.f32.mrb[6].mxu1 }
 0x125   :  { %v678_v42 = vpack.c.bf16 %v802_v40, %v801_v36  ;;  %v718_v43 = vpack.c.bf16 %v818_v41, %v817_v37  ;;  %v286_v44 = vpop.f32.mrb[7].mxu0  ;;  %v350_v45 = vpop.f32.mrb[7].mxu1 }
 0x126   :  { %v673_v46 = vpack.c.bf16 %v286_v44, %v283_v38  ;;  %v713_v47 = vpack.c.bf16 %v350_v45, %v347_v39 }
 0x127   :  { %742 = vst [vmem:[#allocation7 + $0x18] sm:$0xff] %v678_v42   ;;  %750 = vst [vmem:[#allocation7 + $0x58] sm:$0xff] %v718_v43  }
 0x128   :  { %741 = vst [vmem:[#allocation7 + $0x10] sm:$0xff] %v673_v46   ;;  %749 = vst [vmem:[#allocation7 + $0x50] sm:$0xff] %v713_v47  }
 0x12a   :  { %v805_v48 = vpop.f32.mrb[8].mxu0  ;;  %v821_v49 = vpop.f32.mrb[8].mxu1 }
 0x12b   :  { %v299_v50 = vpop.f32.mrb[9].mxu0  ;;  %v363_v51 = vpop.f32.mrb[9].mxu1 }
 0x12c   :  { %v806_v52 = vpop.f32.mrb[10].mxu0  ;;  %v822_v53 = vpop.f32.mrb[10].mxu1 }
 0x12d   :  { %v688_v54 = vpack.c.bf16 %v806_v52, %v805_v48  ;;  %v728_v55 = vpack.c.bf16 %v822_v53, %v821_v49  ;;  %v302_v56 = vpop.f32.mrb[11].mxu0  ;;  %v366_v57 = vpop.f32.mrb[11].mxu1 }
 0x12e   :  { %v683_v58 = vpack.c.bf16 %v302_v56, %v299_v50  ;;  %v723_v59 = vpack.c.bf16 %v366_v57, %v363_v51 }
 0x12f   :  { %744 = vst [vmem:[#allocation7 + $0x28] sm:$0xff] %v688_v54   ;;  %752 = vst [vmem:[#allocation7 + $0x68] sm:$0xff] %v728_v55  }
 0x130   :  { %743 = vst [vmem:[#allocation7 + $0x20] sm:$0xff] %v683_v58   ;;  %751 = vst [vmem:[#allocation7 + $0x60] sm:$0xff] %v723_v59  }
 0x132   :  { %v809_v60 = vpop.f32.mrb[12].mxu0  ;;  %v825_v61 = vpop.f32.mrb[12].mxu1 }
 0x133   :  { %v315_v62 = vpop.f32.mrb[13].mxu0  ;;  %v379_v63 = vpop.f32.mrb[13].mxu1 }
 0x134   :  { %v810_v0 = vpop.f32.mrb[14].mxu0  ;;  %v826_v1 = vpop.f32.mrb[14].mxu1 }
 0x135   :  { %v698_v2 = vpack.c.bf16 %v810_v0, %v809_v60  ;;  %v738_v3 = vpack.c.bf16 %v826_v1, %v825_v61  ;;  %v318_v4 = vpop.f32.mrb[15].mxu0  ;;  %v382_v5 = vpop.f32.mrb[15].mxu1 }
 0x136   :  { %v693_v6 = vpack.c.bf16 %v318_v4, %v315_v62  ;;  %v733_v7 = vpack.c.bf16 %v382_v5, %v379_v63 }
 0x137   :  { %746 = vst [vmem:[#allocation7 + $0x38] sm:$0xff] %v698_v2   ;;  %754 = vst [vmem:[#allocation7 + $0x78] sm:$0xff] %v738_v3  }
 0x138   :  { %745 = vst [vmem:[#allocation7 + $0x30] sm:$0xff] %v693_v6   ;;  %753 = vst [vmem:[#allocation7 + $0x70] sm:$0xff] %v733_v7  }
 0x139   :  { %927 = shalt.err (!%p924_p6)
}
 0x13a   :  { %s928_s10 = scalar_lea.hbm %s1011_s2, 2048 }
 0x13b   :  { %p929_p7 = scmp.ne.s32.totalorder %s1011_s2, %s928_s10  ;;  %p932_p8 = scmp.lt.u32.totalorder %s928_s10, %s1011_s2 }
 0x13d   :  { %p934_p9 = pnand %p932_p8, %p929_p7 }
 0x13f   :  { %937 = shalt.err (!%p934_p9)
}
 0x140   :  { %565 = dma.vmem_to_hbm [thread:$0]  %s560_s6, 2048, %s1011_s2, [#allocation4], %s945_s19, %s945_s19, %s946_s20  }
 0x141   :  { %942 = dma.done.wait [#allocation4], 2048  }
 0x142   :  { %943 = vsyncadd [#allocation4], 4294965248 }
 0x143   :  { %569 = vsyncpa [#allocation3], 1 }
 0x144   :  { %570 = vsyncpa [#allocation6], 1 }
 0x145   :  { %571 = vsyncpa [#allocation4], 1 }

</bundles_post_ra>
